<compile_context>
chip_gen: v7x
topology: tpu7x:2x2x1
jax: 0.10.0
libtpu: 0.0.40
codegen_flags: <defaults>
</compile_context>

<pallas_src>
import jax
import jax.numpy as jnp
from jax.experimental import pallas as pl
from jax.experimental.pallas import tpu as pltpu


def _round_up(x: int, m: int) -> int:
    return (x + m - 1) // m * m


def _sigmoid_eup(z):
    # exp -> EUP slot; approximate reciprocal -> EUP vrcp (keeps divide off VALU).
    return pl.reciprocal(1.0 + jnp.exp(-z), approx=True)


def mlp_forward_kernel(x_ref, w1_ref, w2t_ref, o_ref):
    x = x_ref[...]          # (tm, in_size)        f32
    w1 = w1_ref[...]        # (in_size, hidden)    f32, VMEM-resident across grid
    w2t = w2t_ref[...]      # (out_size, hidden)   f32 (W2 transposed in wrapper)

    tm = x_ref.shape[0]
    in_size = x_ref.shape[1]
    out_size = w2t_ref.shape[0]
    lane_pad = o_ref.shape[1]

    # ---- layer 1: X @ W1 with K = in_size (=2) -> VPU broadcast FMAs, no MXU ----
    z = x[:, 0:1] * w1[0:1, :]                      # (tm,1)*(1,hidden) -> (tm,hidden)
    for k in range(1, in_size):                     # static, unrolled at trace time
        z = z + x[:, k:k + 1] * w1[k:k + 1, :]

    z2 = _sigmoid_eup(z)                            # (tm, hidden)

    # ---- layer 2: z2 @ W2 with N = out_size (=1) -> VPU multiply + lane reduce ----
    cols = [
        jnp.sum(z2 * w2t[j:j + 1, :], axis=-1, keepdims=True)   # (tm, 1)
        for j in range(out_size)                                 # static, tiny
    ]
    z3 = cols[0] if out_size == 1 else jnp.concatenate(cols, axis=-1)

    o = _sigmoid_eup(z3)                            # (tm, out_size)

    # ---- lane-dense store: fill the full 128-lane output slab (no masked vst) ----
    if out_size == 1:
        o_full = jnp.broadcast_to(o, (tm, lane_pad))
    else:
        o_full = jnp.concatenate(
            [o, jnp.zeros((tm, lane_pad - out_size), jnp.float32)], axis=-1)
    o_ref[...] = o_full.astype(o_ref.dtype)


def neural_network_forward(x, w1, w2, *, tm_max=512):
    """o = sigmoid(sigmoid(x @ w1) @ w2), computed in a single Pallas kernel."""
    batch, in_size = x.shape
    in_size_w, hidden = w1.shape
    hidden_w, out_size = w2.shape
    assert in_size == in_size_w and hidden == hidden_w

    # Lane-dense output slab width (multiple of 128); wrapper slices real cols.
    lane_pad = _round_up(max(out_size, 1), 128)

    # Batch tile: big enough to amortize per-step overhead, capped so the
    # (tm, hidden) f32 intermediate + double-buffered X/out tiles fit v7x VMEM.
    tm = min(tm_max, _round_up(batch, 8))
    batch_padded = _round_up(batch, tm)
    if batch_padded != batch:
        x = jnp.pad(x, ((0, batch_padded - batch), (0, 0)))

    # Pass W2 transposed so the kernel does a lane reduce (no in-kernel transpose).
    w2t = w2.T                                       # (out_size, hidden)

    grid = (batch_padded // tm,)

    out = pl.pallas_call(
        mlp_forward_kernel,
        out_shape=jax.ShapeDtypeStruct((batch_padded, lane_pad), jnp.float32),
        grid=grid,
        in_specs=[
            # batch tile of X; last dim == full array dim satisfies tiling rule
            pl.BlockSpec((tm, in_size), lambda i: (i, 0)),
            # weights: same block every grid step -> stay VMEM-resident
            pl.BlockSpec((in_size, hidden), lambda i: (0, 0)),
            pl.BlockSpec((out_size, hidden), lambda i: (0, 0)),
        ],
        # lane-dense (multiple-of-128) output tile -> unmasked vector stores
        out_specs=pl.BlockSpec((tm, lane_pad), lambda i: (i, 0)),
        compiler_params=pltpu.CompilerParams(
            # batch axis is embarrassingly parallel -> megacore sharding on v7x
            dimension_semantics=("parallel",),
            vmem_limit_bytes=64 * 1024 * 1024,
        ),
    )(x, w1, w2t)

    # Strip batch padding and the lane padding.
    return out[:batch, :out_size]


def reference_forward(x, w1, w2):
    return jax.nn.sigmoid(jax.nn.sigmoid(x @ w1) @ w2)


if __name__ == "__main__":
    # Shapes implied by the module: inputSize=2, outputSize=1, X has 3 rows.
    # Pick hiddenSize=32.
    input_size, hidden_size, output_size = 2, 32, 1

    key = jax.random.PRNGKey(0)
    k_w1, k_w2 = jax.random.split(key, 2)

    # Same data as the PyTorch script's X (3 samples, 2 features).
    X = jnp.array([[2.0, 9.0], [1.0, 5.0], [3.0, 6.0]], dtype=jnp.float32)

    # Deterministic stand-ins for torch.randn weights.
    W1 = jax.random.normal(k_w1, (input_size, hidden_size), dtype=jnp.float32)
    W2 = jax.random.normal(k_w2, (hidden_size, output_size), dtype=jnp.float32)

    out = neural_network_forward(X, W1, W2)
    out = jax.block_until_ready(out)

    ref = reference_forward(X, W1, W2)
    assert out.shape == (3, output_size)
    # Loosened tolerance: pl.reciprocal(approx=True) is an EUP estimate, and its
    # error compounds through the second layer; outputs are in (0, 1).
    assert jnp.allclose(out, ref, atol=1e-2, rtol=1e-2), (out, ref)

    # TODO(synk): backward()/train()/saveWeights() (training path) are out of
    # scope for the forward-pass kernel and are not implemented here.
    print("KERNEL_OK")
</pallas_src>

<mosaic_0001>
module attributes {stable_mosaic.version = 11 : i64} {
  func.func @mlp_forward_kernel(%arg0: i32, %arg1: memref<8x2xf32, #tpu.memory_space<vmem>>, %arg2: memref<2x32xf32, #tpu.memory_space<vmem>>, %arg3: memref<1x32xf32, #tpu.memory_space<vmem>>, %arg4: memref<8x128xf32, #tpu.memory_space<vmem>>) attributes {dimension_semantics = [#tpu.dimension_semantics<parallel>], iteration_bounds = array<i64: 1>, scalar_prefetch = 0 : i64, scratch_operands = 0 : i64, tpu.core_type = #tpu.core_type<tc>, window_params = [{transform_indices = @transform_0, window_bounds = array<i64: 8, 2>}, {pipeline_mode = #tpu.pipeline_mode<synchronous>, transform_indices = @transform_1, window_bounds = array<i64: 2, 32>}, {pipeline_mode = #tpu.pipeline_mode<synchronous>, transform_indices = @transform_2, window_bounds = array<i64: 1, 32>}, {transform_indices = @transform_3, window_bounds = array<i64: 8, 128>}]} {
    %c0 = arith.constant 0 : index
    %c0_0 = arith.constant 0 : index
    %0 = vector.load %arg1[%c0, %c0_0] : memref<8x2xf32, #tpu.memory_space<vmem>>, vector<8x2xf32>
    %c0_1 = arith.constant 0 : index
    %c0_2 = arith.constant 0 : index
    %1 = vector.load %arg2[%c0_1, %c0_2] : memref<2x32xf32, #tpu.memory_space<vmem>>, vector<2x32xf32>
    %c0_3 = arith.constant 0 : index
    %c0_4 = arith.constant 0 : index
    %2 = vector.load %arg3[%c0_3, %c0_4] : memref<1x32xf32, #tpu.memory_space<vmem>>, vector<1x32xf32>
    %3 = vector.extract_strided_slice %0 {offsets = [0, 0], sizes = [8, 1], strides = [1, 1]} : vector<8x2xf32> to vector<8x1xf32>
    %4 = vector.extract_strided_slice %1 {offsets = [0, 0], sizes = [1, 32], strides = [1, 1]} : vector<2x32xf32> to vector<1x32xf32>
    %5 = vector.broadcast %3 : vector<8x1xf32> to vector<8x32xf32>
    %6 = vector.broadcast %4 : vector<1x32xf32> to vector<8x32xf32>
    %7 = arith.mulf %5, %6 : vector<8x32xf32>
    %8 = vector.extract_strided_slice %0 {offsets = [0, 1], sizes = [8, 1], strides = [1, 1]} : vector<8x2xf32> to vector<8x1xf32>
    %9 = vector.extract_strided_slice %1 {offsets = [1, 0], sizes = [1, 32], strides = [1, 1]} : vector<2x32xf32> to vector<1x32xf32>
    %10 = vector.broadcast %8 : vector<8x1xf32> to vector<8x32xf32>
    %11 = vector.broadcast %9 : vector<1x32xf32> to vector<8x32xf32>
    %12 = arith.mulf %10, %11 : vector<8x32xf32>
    %13 = arith.addf %7, %12 : vector<8x32xf32>
    %cst = arith.constant 0.000000e+00 : f32
    %14 = vector.broadcast %cst : f32 to vector<8x32xf32>
    %15 = arith.subf %14, %13 : vector<8x32xf32>
    %16 = math.exp %15 : vector<8x32xf32>
    %cst_5 = arith.constant 1.000000e+00 : f32
    %17 = vector.broadcast %cst_5 : f32 to vector<8x32xf32>
    %18 = arith.addf %17, %16 : vector<8x32xf32>
    %19 = tpu.reciprocal %18 {approx = true} : vector<8x32xf32> -> vector<8x32xf32>
    %20 = vector.broadcast %2 : vector<1x32xf32> to vector<8x32xf32>
    %21 = arith.mulf %19, %20 : vector<8x32xf32>
    %cst_6 = arith.constant dense<0.000000e+00> : vector<8xf32>
    %22 = vector.multi_reduction <add>, %21, %cst_6 [1] : vector<8x32xf32> to vector<8xf32>
    %23 = vector.shape_cast %22 : vector<8xf32> to vector<8x1xf32>
    %cst_7 = arith.constant 0.000000e+00 : f32
    %24 = vector.broadcast %cst_7 : f32 to vector<8x1xf32>
    %25 = arith.subf %24, %23 : vector<8x1xf32>
    %26 = math.exp %25 : vector<8x1xf32>
    %cst_8 = arith.constant 1.000000e+00 : f32
    %27 = vector.broadcast %cst_8 : f32 to vector<8x1xf32>
    %28 = arith.addf %27, %26 : vector<8x1xf32>
    %29 = tpu.reciprocal %28 {approx = true} : vector<8x1xf32> -> vector<8x1xf32>
    %30 = vector.shape_cast %29 : vector<8x1xf32> to vector<8x1xf32>
    %31 = vector.broadcast %30 : vector<8x1xf32> to vector<8x128xf32>
    %c0_9 = arith.constant 0 : index
    %c0_10 = arith.constant 0 : index
    %32 = vector.load %arg4[%c0_9, %c0_10] : memref<8x128xf32, #tpu.memory_space<vmem>>, vector<8x128xf32>
    tpu.vector_store %arg4[%c0_9, %c0_10], %31 {strides = array<i32>} : memref<8x128xf32, #tpu.memory_space<vmem>>, vector<8x128xf32>,
    return
  }
  func.func @transform_0(%arg0: i32) -> (i32, i32) {
    %c0_i32 = arith.constant 0 : i32
    %c0_i32_0 = arith.constant 0 : i32
    return %arg0, %c0_i32 : i32, i32
  }
  func.func @transform_1(%arg0: i32) -> (i32, i32) {
    %c0_i32 = arith.constant 0 : i32
    %c0_i32_0 = arith.constant 0 : i32
    %c0_i32_1 = arith.constant 0 : i32
    return %c0_i32, %c0_i32_0 : i32, i32
  }
  func.func @transform_2(%arg0: i32) -> (i32, i32) {
    %c0_i32 = arith.constant 0 : i32
    %c0_i32_0 = arith.constant 0 : i32
    %c0_i32_1 = arith.constant 0 : i32
    return %c0_i32, %c0_i32_0 : i32, i32
  }
  func.func @transform_3(%arg0: i32) -> (i32, i32) {
    %c0_i32 = arith.constant 0 : i32
    %c0_i32_0 = arith.constant 0 : i32
    return %arg0, %c0_i32 : i32, i32
  }
}

</mosaic_0001>

<bundles_post_ra>
// kernel: tpu_custom_call.1
= control target key start
LH: loop header
LB: loop body
LE: loop exit
PB: predicated region body
PF: predicated region fallthrough
CT: control target
= control target key end

     0   :  { %8 = vsyncpa [#allocation3], 0  ;;  %s296_s0 = inlined_call_operand.hbm [shape: f32[8,2], index: 0, kind: input, shape index: {}]   ;;  %s297_s1 = inlined_call_operand.hbm [shape: f32[2,32], index: 1, kind: input, shape index: {}]   ;;  %s298_s2 = inlined_call_operand.hbm [shape: f32[1,32], index: 2, kind: input, shape index: {}]   ;;  %s299_s3 = inlined_call_operand.hbm [shape: f32[8,128], index: 3, kind: output, shape index: {}]  }
   0x1   :  { %9 = vsyncpa [#allocation6], 0 }
   0x2   :  { %10 = vsyncpa [#allocation4], 0  ;;  %s222_s12 = smov [#allocation5]   ;;  %s223_s14 = smov [#allocation2]  }
   0x3   :  { %s27_s13 = sshll.u32 %s222_s12, 4  ;;  %s17_s15 = sshll.u32 %s223_s14, 4  ;;  %s28_s13 = int_to_ptr.vmem [resolvable:$true] %s27_s13  ;;  %s18_s15 = int_to_ptr.vmem [resolvable:$true] %s17_s15 }
   0x4   :  { %s128_s18 = scalar_lea.hbm %s297_s1, 32 }
   0x5   :  { %p129_p0 = scmp.ne.s32.totalorder %s297_s1, %s128_s18  ;;  %p132_p1 = scmp.lt.u32.totalorder %s128_s18, %s297_s1 }
   0x7   :  { %p134_p2 = pnand %p132_p1, %p129_p0 }
   0x9   :  { %137 = shalt.err (!%p134_p2)
}
   0xa   :  { %s138_s23 = scalar_lea.vmem %s28_s13, 32  ;;  %p143_p4 = scmp.lt.s32.totalorder %s28_s13, %s28_s13 }
   0xb   :  { %p139_p3 = scmp.ne.s32.totalorder %s28_s13, %s138_s23  ;;  %p144_p5 = scmp.lt.s32.totalorder %s138_s23, %s138_s23 }
   0xd   :  { %p145_p6 = por %p144_p5, %p143_p4 }
   0xf   :  { %p146_p7 = pnand %p145_p6, %p139_p3 }
  0x11   :  { %149 = shalt.err (!%p146_p7)
}
  0x12   :  { %30 = dma.hbm_to_vmem [thread:$0]  %s297_s1, 32, %s28_s13, [#allocation6]  }
  0x13   :  { %s150_s28 = scalar_lea.hbm %s296_s0, 128 }
  0x14   :  { %p151_p8 = scmp.ne.s32.totalorder %s296_s0, %s150_s28  ;;  %p154_p9 = scmp.lt.u32.totalorder %s150_s28, %s296_s0 }
  0x16   :  { %p156_p10 = pnand %p154_p9, %p151_p8 }
  0x18   :  { %159 = shalt.err (!%p156_p10)
}
  0x19   :  { %s160_s6 = scalar_lea.vmem %s18_s15, 128  ;;  %p165_p12 = scmp.lt.s32.totalorder %s18_s15, %s18_s15 }
  0x1a   :  { %p161_p11 = scmp.ne.s32.totalorder %s18_s15, %s160_s6  ;;  %p166_p13 = scmp.lt.s32.totalorder %s160_s6, %s160_s6 }
  0x1c   :  { %p167_p0 = por %p166_p13, %p165_p12 }
  0x1e   :  { %p168_p1 = pnand %p167_p0, %p161_p11 }
  0x20   :  { %171 = shalt.err (!%p168_p1)
}
  0x21   :  { %20 = dma.hbm_to_vmem [thread:$0]  %s296_s0, 128, %s18_s15, [#allocation3]  }
  0x22   :  { %s224_s8 = smov [#allocation7]   ;;  %s172_s12 = scalar_lea.hbm %s298_s2, 16 }
  0x23   :  { %s37_s9 = sshll.u32 %s224_s8, 4  ;;  %p173_p2 = scmp.ne.s32.totalorder %s298_s2, %s172_s12  ;;  %s38_s9 = int_to_ptr.vmem [resolvable:$true] %s37_s9 }
  0x24   :  { %p176_p3 = scmp.lt.u32.totalorder %s172_s12, %s298_s2 }
  0x26   :  { %p178_p4 = pnand %p176_p3, %p173_p2 }
  0x28   :  { %181 = shalt.err (!%p178_p4)
}
  0x29   :  { %s182_s18 = scalar_lea.vmem %s38_s9, 16  ;;  %s186_s0 = scalar_lea.vmem %s38_s9, 32 }
  0x2a   :  { %p183_p5 = scmp.ne.s32.totalorder %s38_s9, %s182_s18  ;;  %p187_p6 = scmp.lt.s32.totalorder %s38_s9, %s38_s9 }
  0x2b   :  { %p188_p7 = scmp.lt.s32.totalorder %s186_s0, %s182_s18 }
  0x2d   :  { %p189_p8 = por %p188_p7, %p187_p6 }
  0x2f   :  { %p190_p9 = pnand %p189_p8, %p183_p5 }
  0x31   :  { %193 = shalt.err (!%p190_p9)
}
  0x32   :  { %40 = dma.hbm_to_vmem [thread:$0]  %s298_s2, 16, %s38_s9, [#allocation6]  }
  0x33   :  { %216 = dma.done.wait [#allocation3], 128  }
  0x34   :  { %217 = vsyncadd [#allocation3], 4294967168 }
  0x35   :  { %218 = dma.done.wait [#allocation6], 48  }
  0x36   :  { %219 = vsyncadd [#allocation6], 4294967248  ;;  %v225_v0 = vmov 0   ;;  %v50_v1 = vld [vmem:[#allocation2] sm:$0xff]  ;;  %v226_v2 = vmov 1   ;;  %v58_v3 = vlaneseq  ;;  %vm85_vm0 = vcmask 261120  }
  0x37   :  { %118 = vset.pattern.permute.xlu0 %v225_v0  ;;  %v51_v7 = vld [vmem:[#allocation5] sm:$0x3]  ;;  %v111_v19 = vld [vmem:[#allocation7] ss:$0 sm:$0xff]  ;;  %s227_s2 = smov [#allocation8]  }
  0x38   :  { %55 = vperm.xlu0 %118, %v50_v1   ;;  %v59_v4 = vshrl.u32 %v58_v3, 7  ;;  %s101_s20 = sshll.u32 %s227_s2, 4  ;;  %s102_s20 = int_to_ptr.vmem [resolvable:$true] %s101_s20 }
  0x39   :  { %s194_s21 = scalar_lea.vmem %s102_s20, 128  ;;  %p199_p11 = scmp.lt.s32.totalorder %s102_s20, %s102_s20 }
  0x3a   :  { %v60_v5 = vsub.s32 0, %v59_v4  ;;  %v69_v6 = vsub.s32 1, %v59_v4  ;;  %p195_p10 = scmp.ne.s32.totalorder %s102_s20, %s194_s21  ;;  %p200_p12 = scmp.lt.s32.totalorder %s194_s21, %s194_s21 }
  0x3c   :  { %119 = vset.pattern.permute.xlu0 %v226_v2  ;;  %v61_v9 = vrot.slane %v51_v7, %v60_v5  ;;  %v70_v10 = vrot.slane %v51_v7, %v69_v6  ;;  %p201_p13 = por %p200_p12, %p199_p11 }
  0x3d   :  { %64 = vperm.xlu0 %119, %v50_v1  }
  0x3e   :  { %p202_p0 = pnand %p201_p13, %p195_p10 }
  0xb7   :  { %v56_v8 = vpop.permute.xlu0 %55 }
  0xb8   :  { %v62_v12 = vmul.f32 %v61_v9, %v56_v8 }
  0xbc   :  { %v65_v11 = vpop.permute.xlu0 %64 }
  0xbd   :  { %v71_v13 = vmul.f32 %v70_v10, %v65_v11 }
  0xbf   :  { %v72_v14 = vadd.f32 %v71_v13, %v62_v12 }
  0xc1   :  { %v73_v15 = vsub.f32 0.0, %v72_v14 }
  0xc3   :  { %v74_v16 = vmul.f32 1.442695, %v73_v15 }
  0xc5   :  { %120 = vpow2.f32 %v74_v16 }
  0xcf   :  { %v121_v17 = vpop.eup %120 }
  0xd0   :  { %v76_v18 = vadd.f32 1.0, %v121_v17 }
  0xd2   :  { %122 = vrcp.f32 %v76_v18 }
  0xdc   :  { %v123_v20 = vpop.eup %122 }
  0xdd   :  { %v84_v21 = vmul.f32 %v123_v20, %v111_v19 }
  0xdf   :  { %v86_v22 = vsel %vm85_vm0, %v84_v21, 0.0 }
  0xe0   :  { %87 = vadd.xlane.f32.xlu1 %v86_v22 }
 0x16d   :  { %v88_v23 = vpop.xlane.xlu1 %87 }
 0x16e   :  { %v89_v24 = vsub.f32 0.0, %v88_v23 }
 0x170   :  { %v90_v25 = vmul.f32 1.442695, %v89_v24 }
 0x172   :  { %124 = vpow2.f32 %v90_v25 }
 0x17c   :  { %v125_v26 = vpop.eup %124 }
 0x17d   :  { %v92_v27 = vadd.f32 1.0, %v125_v26 }
 0x17f   :  { %126 = vrcp.f32 %v92_v27 }
 0x189   :  { %v127_v28 = vpop.eup %126 }
 0x18a   :  { %94 = vst [vmem:[#allocation8] sm:$0xff] %v127_v28 }
 0x18b   :  { %205 = shalt.err (!%p202_p0)
}
 0x18c   :  { %s206_s24 = scalar_lea.hbm %s299_s3, 128 }
 0x18d   :  { %p207_p1 = scmp.ne.s32.totalorder %s299_s3, %s206_s24  ;;  %p210_p2 = scmp.lt.u32.totalorder %s206_s24, %s299_s3 }
 0x18f   :  { %p212_p3 = pnand %p210_p2, %p207_p1 }
 0x191   :  { %215 = shalt.err (!%p212_p3)
}
 0x192   :  { %104 = dma.vmem_to_hbm [thread:$0]  %s102_s20, 128, %s299_s3, [#allocation4]  }
 0x193   :  { %220 = dma.done.wait [#allocation4], 128  }
 0x194   :  { %221 = vsyncadd [#allocation4], 4294967168 }
 0x195   :  { %108 = vsyncpa [#allocation3], 1 }
 0x196   :  { %109 = vsyncpa [#allocation6], 1 }
 0x197   :  { %110 = vsyncpa [#allocation4], 1 }

</bundles_post_ra>
